<compile_context>
chip_gen: v7x
topology: tpu7x:2x2x1
jax: 0.10.0
libtpu: 0.0.40
codegen_flags: <defaults>
</compile_context>

<pallas_src>
import jax
import jax.numpy as jnp
from jax.experimental import pallas as pl
from jax.experimental.pallas import tpu as pltpu


# ---------------------------------------------------------------------------
# Kernel
# ---------------------------------------------------------------------------
def dueling_mlp_kernel(x_ref, w1_ref, b1_ref, wq_ref, bq_ref, out_ref):
    # Hidden layer — MXU matmul with f32 accumulation, VPU bias + relu in f32.
    h = jnp.dot(x_ref[...], w1_ref[...], preferred_element_type=jnp.float32)
    h = jnp.maximum(h + b1_ref[...], 0.0)
    # Folded dueling head: a single matmul yields the Q-values directly.
    q = jnp.dot(h.astype(wq_ref.dtype), wq_ref[...],
                preferred_element_type=jnp.float32) + bq_ref[...]
    out_ref[...] = q.astype(out_ref.dtype)


# ---------------------------------------------------------------------------
# One-time parameter fusion (hoist out of the per-step path)
# ---------------------------------------------------------------------------
def fuse_dueling_params(w1, b1, wv, bv, wa, ba, *, compute_dtype=jnp.bfloat16):
    """Fold the dueling aggregation into the head weights.

    out = v + adv - mean(adv)
        = h @ (Wa + Wv - mean_k Wa[:,k]) + (ba + bv - mean_k ba[k])

    Call this ONCE per parameter update, not per forward call.
    """
    wq = wa + wv - jnp.mean(wa, axis=1, keepdims=True)            # (hid, out_dim)
    bq = (ba + bv - jnp.mean(ba, axis=1, keepdims=True)).astype(jnp.float32)
    b1 = b1.astype(jnp.float32)
    if compute_dtype is not None:
        w1 = w1.astype(compute_dtype)
        wq = wq.astype(compute_dtype)
    return w1, b1, wq, bq


# ---------------------------------------------------------------------------
# VMEM sizing helpers (lane-padding aware)
# ---------------------------------------------------------------------------
def _round_up(n, m):
    return ((n + m - 1) // m) * m


def _vmem_block_bytes(rows, cols, dtype):
    """Bytes a (rows, cols) block occupies in VMEM: last dim pads to 128 lanes,
    second-to-last to 8 sublanes (16 for bf16, 32 for int8 due to packing)."""
    itemsize = jnp.dtype(dtype).itemsize
    sublane = max(8, (8 * 4) // max(1, itemsize))
    return _round_up(rows, sublane) * _round_up(cols, 128) * itemsize


def _estimate_vmem(batch_tile, in_dim, hid, out_dim, x_dtype, w_dtype, out_dtype):
    est = 0
    # Pipelined blocks are double-buffered.
    est += 2 * _vmem_block_bytes(batch_tile, in_dim, x_dtype)       # x tile
    est += 2 * _vmem_block_bytes(batch_tile, out_dim, out_dtype)    # out tile
    est += 2 * (_vmem_block_bytes(in_dim, hid, w_dtype)             # W1
                + _vmem_block_bytes(1, hid, jnp.float32)            # b1
                + _vmem_block_bytes(hid, out_dim, w_dtype)          # Wq
                + _vmem_block_bytes(1, out_dim, jnp.float32))       # bq
    # In-kernel intermediates: h (f32), h cast to compute dtype, q (f32).
    est += _vmem_block_bytes(batch_tile, hid, jnp.float32)
    est += _vmem_block_bytes(batch_tile, hid, w_dtype)
    est += _vmem_block_bytes(batch_tile, out_dim, jnp.float32)
    return est


# ---------------------------------------------------------------------------
# Forward wrapper
# ---------------------------------------------------------------------------
def dueling_mlp_forward(x, w1, b1, wq, bq, *, batch_tile=None,
                        compute_dtype=jnp.bfloat16, out_dtype=jnp.float32):
    """DuelingMLPNet forward with pre-fused head params (see fuse_dueling_params).

    x:  (B, in_dim)     w1: (in_dim, hid)   b1: (1, hid)  [f32]
    wq: (hid, out_dim)  bq: (1, out_dim)    [f32]
    compute_dtype: storage/DMA dtype for x (and the pre-cast w1/wq);
                   accumulation and bias/relu stay f32.
    """
    B, in_dim = x.shape
    hid = w1.shape[1]
    out_dim = wq.shape[1]

    if compute_dtype is not None and x.dtype != compute_dtype:
        # Cheapest when x is already stored in compute_dtype upstream.
        x = x.astype(compute_dtype)

    # Tile selection: large tiles amortize the ~0.35 µs per-grid-step overhead,
    # but big batches keep >=4 grid steps so the "parallel" axis can shard
    # across v7x's 2 TensorCores. Cap 4096 rows fits the default scoped VMEM.
    if batch_tile is None:
        target = pl.cdiv(B, 4)                      # aim for >=4 steps when B is big
        batch_tile = max(8, min(4096, _round_up(target, 8)))
        batch_tile = min(batch_tile, _round_up(B, 8))
    batch_tile = max(8, _round_up(int(batch_tile), 8))

    # No jnp.pad: Pallas masks out-of-range writes of the final partial block
    # (rows are independent; no cross-row reduction reads the garbage rows).
    grid = (pl.cdiv(B, batch_tile),)

    rep2 = lambda i: (0, 0)   # replicated weights/biases: same block every step

    # Lane-padding-aware VMEM estimate; only raise the scoped limit when needed,
    # and never above (3/4 of) physical VMEM (v7x: 64 MiB / TC).
    est_vmem = _estimate_vmem(batch_tile, in_dim, hid, out_dim,
                              x.dtype, wq.dtype, out_dtype)
    cparams = dict(dimension_semantics=("parallel",))
    default_scoped = 16 * 1024 * 1024
    if est_vmem > default_scoped:
        try:
            vmem_cap = int(pltpu.get_tpu_info().vmem_capacity_bytes)
        except Exception:
            vmem_cap = 64 * 1024 * 1024             # conservative (v7x per-TC)
        ceiling = (vmem_cap * 3) // 4               # headroom for compiler scratch
        cparams["vmem_limit_bytes"] = int(min(max(2 * est_vmem, default_scoped),
                                              ceiling))

    # Advisory cost: tiny, bandwidth-bound call — helps XLA overlap neighbors.
    bytes_accessed = (B * in_dim * x.dtype.itemsize
                      + B * out_dim * jnp.dtype(out_dtype).itemsize
                      + w1.size * w1.dtype.itemsize + wq.size * wq.dtype.itemsize
                      + b1.size * b1.dtype.itemsize + bq.size * bq.dtype.itemsize)
    cost = pl.CostEstimate(flops=2 * B * (in_dim * hid + hid * out_dim),
                           transcendentals=0,
                           bytes_accessed=int(bytes_accessed))

    out = pl.pallas_call(
        dueling_mlp_kernel,
        out_shape=jax.ShapeDtypeStruct((B, out_dim), out_dtype),
        grid=grid,
        in_specs=[
            pl.BlockSpec((batch_tile, in_dim), lambda i: (i, 0)),   # x
            pl.BlockSpec((in_dim, hid), rep2),                      # W1
            pl.BlockSpec((1, hid), rep2),                           # b1
            pl.BlockSpec((hid, out_dim), rep2),                     # Wq (folded heads)
            pl.BlockSpec((1, out_dim), rep2),                       # bq
        ],
        out_specs=pl.BlockSpec((batch_tile, out_dim), lambda i: (i, 0)),
        compiler_params=pltpu.CompilerParams(**cparams),
        cost_estimate=cost,
    )(x, w1, b1, wq, bq)
    return out


# ---------------------------------------------------------------------------
# Init helpers + self-test
# ---------------------------------------------------------------------------
def xavier_uniform(key, shape):
    # shape = (fan_in, fan_out) since weights are stored pre-transposed.
    fan_in, fan_out = shape
    bound = jnp.sqrt(6.0 / (fan_in + fan_out))
    return jax.random.uniform(key, shape, jnp.float32, -bound, bound)


def _reference(x, w1, b1, wv, bv, wa, ba):
    h = jnp.maximum(x @ w1 + b1, 0.0)
    v = h @ wv + bv
    adv = h @ wa + ba
    return v + adv - jnp.mean(adv, axis=-1, keepdims=True)


if __name__ == "__main__":
    # Shapes consistent with the module's example spec:
    #   in_dim=16, hid_layers=[32], out_dim=8 (discrete Q actions), batch=8.
    B, in_dim, hid, out_dim = 8, 16, 32, 8

    key = jax.random.PRNGKey(0)
    kx, k1, kv, ka, kx2 = jax.random.split(key, 5)

    x = jax.random.normal(kx, (B, in_dim), jnp.float32)

    # Deterministic parameter init (xavier_uniform weights, zero biases).
    w1 = xavier_uniform(k1, (in_dim, hid))
    b1 = jnp.zeros((1, hid), jnp.float32)
    wv = xavier_uniform(kv, (hid, 1))
    bv = jnp.zeros((1, 1), jnp.float32)
    wa = xavier_uniform(ka, (hid, out_dim))
    ba = jnp.zeros((1, out_dim), jnp.float32)

    ref = _reference(x, w1, b1, wv, bv, wa, ba)

    # --- f32 path (folded heads; numerically equivalent, not bit-identical) ---
    f32_params = fuse_dueling_params(w1, b1, wv, bv, wa, ba, compute_dtype=None)
    out_f32 = jax.block_until_ready(
        dueling_mlp_forward(x, *f32_params, compute_dtype=None))
    assert out_f32.shape == (B, out_dim)
    assert jnp.allclose(out_f32, ref, atol=1e-4, rtol=1e-4), "f32 path mismatch"

    # --- default bf16 storage path (f32 accumulation) ---
    bf16_params = fuse_dueling_params(w1, b1, wv, bv, wa, ba)   # bf16 by default
    out_bf16 = jax.block_until_ready(dueling_mlp_forward(x, *bf16_params))
    assert jnp.allclose(out_bf16, ref, atol=5e-2, rtol=5e-2), "bf16 path mismatch"

    # --- ragged batch (no jnp.pad; partial final block, masked writes) ---
    B2 = 13
    x2 = jax.random.normal(kx2, (B2, in_dim), jnp.float32)
    ref2 = _reference(x2, w1, b1, wv, bv, wa, ba)
    out2 = jax.block_until_ready(
        dueling_mlp_forward(x2, *f32_params, compute_dtype=None, batch_tile=8))
    assert out2.shape == (B2, out_dim)
    assert jnp.allclose(out2, ref2, atol=1e-4, rtol=1e-4), "ragged batch mismatch"

    print("KERNEL_OK")
</pallas_src>

<mosaic_0001>
module attributes {stable_mosaic.version = 11 : i64} {
  func.func @dueling_mlp_kernel(%arg0: i32, %arg1: memref<8x16xf32, #tpu.memory_space<vmem>>, %arg2: memref<16x32xf32, #tpu.memory_space<vmem>>, %arg3: memref<1x32xf32, #tpu.memory_space<vmem>>, %arg4: memref<32x8xf32, #tpu.memory_space<vmem>>, %arg5: memref<1x8xf32, #tpu.memory_space<vmem>>, %arg6: memref<8x8xf32, #tpu.memory_space<vmem>>) attributes {dimension_semantics = [#tpu.dimension_semantics<parallel>], iteration_bounds = array<i64: 1>, scalar_prefetch = 0 : i64, scratch_operands = 0 : i64, tpu.core_type = #tpu.core_type<tc>, window_params = [{transform_indices = @transform_0, window_bounds = array<i64: 8, 16>}, {pipeline_mode = #tpu.pipeline_mode<synchronous>, transform_indices = @transform_1, window_bounds = array<i64: 16, 32>}, {pipeline_mode = #tpu.pipeline_mode<synchronous>, transform_indices = @transform_2, window_bounds = array<i64: 1, 32>}, {pipeline_mode = #tpu.pipeline_mode<synchronous>, transform_indices = @transform_3, window_bounds = array<i64: 32, 8>}, {pipeline_mode = #tpu.pipeline_mode<synchronous>, transform_indices = @transform_4, window_bounds = array<i64: 1, 8>}, {transform_indices = @transform_5, window_bounds = array<i64: 8, 8>}]} {
    %c0 = arith.constant 0 : index
    %c0_0 = arith.constant 0 : index
    %0 = vector.load %arg1[%c0, %c0_0] : memref<8x16xf32, #tpu.memory_space<vmem>>, vector<8x16xf32>
    %c0_1 = arith.constant 0 : index
    %c0_2 = arith.constant 0 : index
    %1 = vector.load %arg2[%c0_1, %c0_2] : memref<16x32xf32, #tpu.memory_space<vmem>>, vector<16x32xf32>
    %cst = arith.constant dense<0.000000e+00> : vector<8x32xf32>
    %2 = tpu.matmul %0, %1, %cst {dimension_numbers = #tpu.dot_dimension_numbers<[1], [0], [0], [1], [0, 0, 1, 1], [], []>} : vector<8x16xf32>, vector<16x32xf32>, vector<8x32xf32> -> vector<8x32xf32>
    %c0_3 = arith.constant 0 : index
    %c0_4 = arith.constant 0 : index
    %3 = vector.load %arg3[%c0_3, %c0_4] : memref<1x32xf32, #tpu.memory_space<vmem>>, vector<1x32xf32>
    %4 = vector.broadcast %3 : vector<1x32xf32> to vector<8x32xf32>
    %5 = arith.addf %2, %4 : vector<8x32xf32>
    %cst_5 = arith.constant 0.000000e+00 : f32
    %6 = vector.broadcast %cst_5 : f32 to vector<8x32xf32>
    %7 = arith.maximumf %5, %6 : vector<8x32xf32>
    %c0_6 = arith.constant 0 : index
    %c0_7 = arith.constant 0 : index
    %8 = vector.load %arg4[%c0_6, %c0_7] : memref<32x8xf32, #tpu.memory_space<vmem>>, vector<32x8xf32>
    %cst_8 = arith.constant dense<0.000000e+00> : vector<8x8xf32>
    %9 = tpu.matmul %7, %8, %cst_8 {dimension_numbers = #tpu.dot_dimension_numbers<[1], [0], [0], [1], [0, 0, 1, 1], [], []>} : vector<8x32xf32>, vector<32x8xf32>, vector<8x8xf32> -> vector<8x8xf32>
    %c0_9 = arith.constant 0 : index
    %c0_10 = arith.constant 0 : index
    %10 = vector.load %arg5[%c0_9, %c0_10] : memref<1x8xf32, #tpu.memory_space<vmem>>, vector<1x8xf32>
    %11 = vector.broadcast %10 : vector<1x8xf32> to vector<8x8xf32>
    %12 = arith.addf %9, %11 : vector<8x8xf32>
    %c0_11 = arith.constant 0 : index
    %c0_12 = arith.constant 0 : index
    %13 = vector.load %arg6[%c0_11, %c0_12] : memref<8x8xf32, #tpu.memory_space<vmem>>, vector<8x8xf32>
    tpu.vector_store %arg6[%c0_11, %c0_12], %12 {strides = array<i32>} : memref<8x8xf32, #tpu.memory_space<vmem>>, vector<8x8xf32>,
    return
  }
  func.func @transform_0(%arg0: i32) -> (i32, i32) {
    %c0_i32 = arith.constant 0 : i32
    %c0_i32_0 = arith.constant 0 : i32
    return %arg0, %c0_i32 : i32, i32
  }
  func.func @transform_1(%arg0: i32) -> (i32, i32) {
    %c0_i32 = arith.constant 0 : i32
    %c0_i32_0 = arith.constant 0 : i32
    %c0_i32_1 = arith.constant 0 : i32
    return %c0_i32, %c0_i32_0 : i32, i32
  }
  func.func @transform_2(%arg0: i32) -> (i32, i32) {
    %c0_i32 = arith.constant 0 : i32
    %c0_i32_0 = arith.constant 0 : i32
    %c0_i32_1 = arith.constant 0 : i32
    return %c0_i32, %c0_i32_0 : i32, i32
  }
  func.func @transform_3(%arg0: i32) -> (i32, i32) {
    %c0_i32 = arith.constant 0 : i32
    %c0_i32_0 = arith.constant 0 : i32
    %c0_i32_1 = arith.constant 0 : i32
    return %c0_i32, %c0_i32_0 : i32, i32
  }
  func.func @transform_4(%arg0: i32) -> (i32, i32) {
    %c0_i32 = arith.constant 0 : i32
    %c0_i32_0 = arith.constant 0 : i32
    %c0_i32_1 = arith.constant 0 : i32
    return %c0_i32, %c0_i32_0 : i32, i32
  }
  func.func @transform_5(%arg0: i32) -> (i32, i32) {
    %c0_i32 = arith.constant 0 : i32
    %c0_i32_0 = arith.constant 0 : i32
    return %arg0, %c0_i32 : i32, i32
  }
}

</mosaic_0001>

<bundles_post_ra>
// kernel: tpu_custom_call.1
= control target key start
LH: loop header
LB: loop body
LE: loop exit
PB: predicated region body
PF: predicated region fallthrough
CT: control target
= control target key end

     0   :  { %v274_v2 = vmov 0.0|0.0   ;;  %vm275_vm0 = vmmov 0   ;;  %v276_v4 = vmov 0.0   ;;  %s347_s0 = inlined_call_operand.vmem [shape: f32[8,16], index: 0, kind: input, shape index: {}]   ;;  %s348_s1 = inlined_call_operand.vmem [shape: f32[16,32], index: 1, kind: input, shape index: {}]   ;;  %s349_s2 = inlined_call_operand.vmem [shape: f32[1,32], index: 2, kind: input, shape index: {}]   ;;  %s350_s3 = inlined_call_operand.vmem [shape: f32[32,8], index: 3, kind: input, shape index: {}]   ;;  %s351_s4 = inlined_call_operand.vmem [shape: f32[1,8], index: 4, kind: input, shape index: {}]   ;;  %s352_s5 = inlined_call_operand.hbm [shape: f32[8,8], index: 5, kind: output, shape index: {}]  }
   0x1   :  { %v22_v0 = vld [vmem:[%s348_s1] sm:$0xff]  ;;  %v23_v1 = vld [vmem:[%s348_s1 + $0x8] sm:$0xff]  ;;  %237 = vmatprep.subr.bf16.mxu0 %v274_v2  ;;  %223 = vmatprep.mubr.msk.f32.mxu0 %vm275_vm0, %v276_v4 }
   0x2   :  { %v238_v3 = vpack.c.bf16 %v23_v1, %v22_v0  ;;  %v106_v5 = vld [vmem:[%s350_s3] sm:$0xff]  ;;  %v107_v6 = vld [vmem:[%s350_s3 + $0x8] sm:$0xff]  ;;  %240 = vmatprep.subr.bf16.mxu1 %v274_v2  ;;  %234 = vmatprep.mubr.msk.f32.mxu1 %vm275_vm0, %v276_v4 }
   0x3   :  { %v241_v7 = vpack.c.bf16 %v107_v6, %v106_v5 }
   0x4   :  { %10 = vsyncpa [#allocation3], 0  ;;  %239 = vmatpush3.bf16.msra.mxu0 %v238_v3  ;;  %v21_v8 = vld [vmem:[%s347_s0] sm:$0xff]  ;;  %vm31_vm1 = vcmask 130048   ;;  %v108_v9 = vld [vmem:[%s350_s3 + $0x10] sm:$0xff]  ;;  %vm117_vm2 = vcmask 261120  }
   0x5   :  { %242 = vmatpush3.bf16.msra.mxu1 %v241_v7  ;;  %v109_v10 = vld [vmem:[%s350_s3 + $0x18] sm:$0xff]  ;;  %v207_v12 = vld [vmem:[%s349_s2] ss:$0 sm:$0xff]  ;;  %s277_s9 = smov [#allocation2]   ;;  %vm191_vm3 = vcmask 64512  }
   0x6   :  { %243 = vmatprep.subr.bf16.mxu1 %v274_v2  ;;  %v244_v11 = vpack.c.bf16 %v109_v10, %v108_v9  ;;  %v209_v17 = vld [vmem:[%s351_s4] ss:$0 sm:$0xff]  ;;  %s199_s10 = sshll.u32 %s277_s9, 4  ;;  %s200_s10 = int_to_ptr.vmem [resolvable:$true] %s199_s10 }
   0x7   :  { %224 = vmatmul.mubr.msk.f32.vlgmr.msra.gmra.mrb[0].mxu0 %vm31_vm1, %v21_v8  ;;  %s250_s3 = scalar_lea.vmem %s200_s10, 128  ;;  %p255_p1 = scmp.lt.s32.totalorder %s200_s10, %s200_s10 }
   0x8   :  { %p251_p0 = scmp.ne.s32.totalorder %s200_s10, %s250_s3  ;;  %p256_p2 = scmp.lt.s32.totalorder %s250_s3, %s250_s3 }
   0x9   :  { %245 = vmatpush3.bf16.msra.mxu1 %v244_v11 }
   0xa   :  { %p257_p3 = por %p256_p2, %p255_p1 }
   0xc   :  { %p258_p4 = pnand %p257_p3, %p251_p0 }
  0xda   :  { %v101_v13 = vpop.f32.mrb[0].mxu0 }
  0xdb   :  { %v102_v14 = vadd.f32 %v207_v12, %v101_v13  ;;  %v225_v15 = vpop.f32.mrb[1].mxu0 }
  0xdd   :  { %v105_v16 = vmax.f32 %v102_v14, 0.0 }
  0xdf   :  { %235 = vmatmul.mubr.msk.f32.vlgmr.msra.gmra.mrb[0].mxu1 %vm117_vm2, %v105_v16 }
 0x1b2   :  { %v187_v18 = vpop.f32.mrb[0].mxu1 }
 0x1b3   :  { %v188_v19 = vadd.f32 %v209_v17, %v187_v18  ;;  %v236_v20 = vpop.f32.mrb[1].mxu1 }
 0x1b5   :  { %192 = vst.msk [vmem:[#allocation2] sm:$0xff] %vm191_vm3, %v188_v19 }
 0x1b6   :  { %261 = shalt.err (!%p258_p4)
}
 0x1b7   :  { %s262_s12 = scalar_lea.hbm %s352_s5, 128 }
 0x1b8   :  { %p263_p5 = scmp.ne.s32.totalorder %s352_s5, %s262_s12  ;;  %p266_p6 = scmp.lt.u32.totalorder %s262_s12, %s352_s5 }
 0x1ba   :  { %p268_p7 = pnand %p266_p6, %p263_p5 }
 0x1bc   :  { %271 = shalt.err (!%p268_p7)
}
 0x1bd   :  { %202 = dma.vmem_to_hbm [thread:$0]  %s200_s10, 128, %s352_s5, [#allocation3]  }
 0x1be   :  { %272 = dma.done.wait [#allocation3], 128  }
 0x1bf   :  { %273 = vsyncadd [#allocation3], 4294967168 }
 0x1c0   :  { %206 = vsyncpa [#allocation3], 1 }

</bundles_post_ra>
